<compile_context>
chip_gen: v6e
topology: v6e:2x2x1
jax: 0.10.0
libtpu: 0.0.40
codegen_flags: <defaults>
</compile_context>

<pallas_src>
import jax
import jax.numpy as jnp
from jax.experimental import pallas as pl
from jax.experimental.pallas import tpu as pltpu

LANE = 128


def _round_up(x, m):
    return pl.cdiv(x, m) * m


def two_tower_kernel(x_ref, w1_ref, b1_ref, w2_ref, b2_ref, out_ref):
    """One batch tile: fused two-tower MLPs + L2 distance.

    x_ref  : (TB, K)  concatenated [item | user] features (bf16 or f32)
    w1_ref : (K, H)   blockdiag(wi1, wu1)
    b1_ref : (1, H)   [bi1 | bu1]
    w2_ref : (H, E)   [[wi2], [-wu2]]  (difference weight)
    b2_ref : (1, E)   bi2 - bu2
    out_ref: (1, TB)  lane-dense per-row L2 distance
    """
    # Layer 1 for both towers at once: Linear -> bias -> ReLU (f32 accum).
    h = jnp.dot(x_ref[...], w1_ref[...], preferred_element_type=jnp.float32)
    h = jnp.maximum(h + b1_ref[...], 0.0)

    # Layer 2 produces item_embed - user_embed directly via the stacked
    # difference weight; bias is pre-folded as (bi2 - bu2).
    d = jnp.dot(h.astype(w2_ref.dtype), w2_ref[...],
                preferred_element_type=jnp.float32) + b2_ref[...]

    # ||item_embed - user_embed||_2 per row. Padded embed columns are exactly
    # zero so they don't perturb the sum of squares. Transpose (XLU) so the
    # reduction lands batch-on-lanes and the store is a full-width vst.
    d2t = jnp.transpose(d * d)                       # (E, TB)
    ssq = jnp.sum(d2t, axis=0, keepdims=True)        # (1, TB) sublane reduce
    out_ref[...] = jnp.sqrt(ssq)


def pack_fused_params(params):
    """Packs the four per-tower weights into two fused, 128-padded operands."""
    wi1, bi1, wi2, bi2 = params["wi1"], params["bi1"], params["wi2"], params["bi2"]
    wu1, bu1, wu2, bu2 = params["wu1"], params["bu1"], params["wu2"], params["bu2"]
    item_feat, hidden = wi1.shape
    user_feat = wu1.shape[0]
    embed = wi2.shape[1]

    feat = item_feat + user_feat
    h2 = 2 * hidden
    K = _round_up(feat, LANE)
    H = _round_up(h2, LANE)
    E = _round_up(embed, LANE)

    # Layer 1: block-diagonal (ReLU is elementwise, so per-tower semantics hold).
    w1 = jnp.zeros((K, H), jnp.float32)
    w1 = w1.at[:item_feat, :hidden].set(wi1)
    w1 = w1.at[item_feat:feat, hidden:h2].set(wu1)
    b1 = jnp.zeros((1, H), jnp.float32)
    b1 = b1.at[:, :hidden].set(bi1)
    b1 = b1.at[:, hidden:h2].set(bu1)

    # Layer 2: stacked difference weight => kernel output is ie - ue directly.
    w2 = jnp.zeros((H, E), jnp.float32)
    w2 = w2.at[:hidden, :embed].set(wi2)
    w2 = w2.at[hidden:h2, :embed].set(-wu2)
    b2 = jnp.zeros((1, E), jnp.float32)
    b2 = b2.at[:, :embed].set(bi2 - bu2)
    return w1, b1, w2, b2, feat


def two_tower_forward(item_x, user_x, params, *, tb=512,
                      compute_dtype=jnp.bfloat16):
    """Fused two-tower forward. Returns [batch] L2 distances."""
    assert tb % LANE == 0, "tb must be a multiple of 128"
    batch = item_x.shape[0]

    w1, b1, w2, b2, feat = pack_fused_params(params)
    K, H = w1.shape
    E = w2.shape[1]

    # Concatenate the two feature streams; pad batch and lane dims.
    x = jnp.concatenate([item_x, user_x], axis=-1)
    batch_pad = _round_up(batch, tb)
    x = jnp.pad(x, ((0, batch_pad - batch), (0, K - feat)))

    # bf16 at the MXU boundary (halves HBM bytes of the dominant input
    # stream); biases, accumulation, ReLU, sqrt remain f32 in-kernel.
    x = x.astype(compute_dtype)
    w1c = w1.astype(compute_dtype)
    w2c = w2.astype(compute_dtype)

    grid = (batch_pad // tb,)
    out = pl.pallas_call(
        two_tower_kernel,
        out_shape=jax.ShapeDtypeStruct((1, batch_pad), jnp.float32),
        grid=grid,
        in_specs=[
            # Streamed batch tile (double-buffered by the Pallas pipeline).
            pl.BlockSpec((tb, K), lambda b: (b, 0)),
            # Weights / biases: constant block index -> VMEM-resident,
            # no re-DMA across grid steps.
            pl.BlockSpec((K, H), lambda b: (0, 0)),
            pl.BlockSpec((1, H), lambda b: (0, 0)),
            pl.BlockSpec((H, E), lambda b: (0, 0)),
            pl.BlockSpec((1, E), lambda b: (0, 0)),
        ],
        # Lane-dense output slab: batch on lanes -> unmasked full-width stores.
        out_specs=pl.BlockSpec((1, tb), lambda b: (0, b)),
        compiler_params=pltpu.CompilerParams(
            dimension_semantics=("parallel",),
        ),
    )(x, w1c, b1, w2c, b2)
    return out[0, :batch]


def init_params(key, item_feat, user_feat, hidden, embed):
    ks = jax.random.split(key, 8)
    scale = 0.05
    return {
        "wi1": scale * jax.random.normal(ks[0], (item_feat, hidden), jnp.float32),
        "bi1": scale * jax.random.normal(ks[1], (1, hidden), jnp.float32),
        "wi2": scale * jax.random.normal(ks[2], (hidden, embed), jnp.float32),
        "bi2": scale * jax.random.normal(ks[3], (1, embed), jnp.float32),
        "wu1": scale * jax.random.normal(ks[4], (user_feat, hidden), jnp.float32),
        "bu1": scale * jax.random.normal(ks[5], (1, hidden), jnp.float32),
        "wu2": scale * jax.random.normal(ks[6], (hidden, embed), jnp.float32),
        "bu2": scale * jax.random.normal(ks[7], (1, embed), jnp.float32),
    }


def reference_forward(item_x, user_x, p):
    ie = jnp.maximum(item_x @ p["wi1"] + p["bi1"], 0.0) @ p["wi2"] + p["bi2"]
    ue = jnp.maximum(user_x @ p["wu1"] + p["bu1"], 0.0) @ p["wu2"] + p["bu2"]
    return jnp.linalg.norm(ie - ue, axis=-1)


if __name__ == "__main__":
    key = jax.random.PRNGKey(0)
    k_item, k_user, k_param, k_item2, k_user2 = jax.random.split(key, 5)

    batch, item_feat, user_feat, hidden, embed = 8, 32, 24, 64, 32

    # items_dict / users_dict collapse to dense per-example feature vectors.
    item_x = jax.random.normal(k_item, (batch, item_feat), jnp.float32)
    user_x = jax.random.normal(k_user, (batch, user_feat), jnp.float32)
    params = init_params(k_param, item_feat, user_feat, hidden, embed)

    # bf16 MXU path (tb=512..1024 for production batches; 128 for this demo).
    out = two_tower_forward(item_x, user_x, params, tb=128)
    out = jax.block_until_ready(out)
    ref = reference_forward(item_x, user_x, params)
    assert out.shape == (batch,)
    assert jnp.allclose(out, ref, atol=2e-2, rtol=2e-2)

    # f32 compute path: tighter check of the fused-kernel structure itself.
    out_f32 = two_tower_forward(item_x, user_x, params, tb=128,
                                compute_dtype=jnp.float32)
    assert jnp.allclose(out_f32, ref, atol=1e-3, rtol=1e-3)

    # Multi-tile grid (300 rows -> 3 tiles of 128, with batch padding):
    # exercises the streaming x BlockSpec, the weight-resident specs, the
    # lane-dense output index_map, and the parallel batch axis.
    batch2 = 300
    item_x2 = jax.random.normal(k_item2, (batch2, item_feat), jnp.float32)
    user_x2 = jax.random.normal(k_user2, (batch2, user_feat), jnp.float32)
    out2 = two_tower_forward(item_x2, user_x2, params, tb=128)
    out2 = jax.block_until_ready(out2)
    ref2 = reference_forward(item_x2, user_x2, params)
    assert out2.shape == (batch2,)
    assert jnp.allclose(out2, ref2, atol=2e-2, rtol=2e-2)

    print("KERNEL_OK")
</pallas_src>

<mosaic_0001>
module attributes {stable_mosaic.version = 11 : i64} {
  func.func @two_tower_kernel(%arg0: i32, %arg1: memref<128x128xbf16, #tpu.memory_space<vmem>>, %arg2: memref<128x128xbf16, #tpu.memory_space<vmem>>, %arg3: memref<1x128xf32, #tpu.memory_space<vmem>>, %arg4: memref<128x128xbf16, #tpu.memory_space<vmem>>, %arg5: memref<1x128xf32, #tpu.memory_space<vmem>>, %arg6: memref<1x128xf32, #tpu.memory_space<vmem>>) attributes {dimension_semantics = [#tpu.dimension_semantics<parallel>], iteration_bounds = array<i64: 1>, scalar_prefetch = 0 : i64, scratch_operands = 0 : i64, tpu.core_type = #tpu.core_type<tc>, window_params = [{transform_indices = @transform_0, window_bounds = array<i64: 128, 128>}, {pipeline_mode = #tpu.pipeline_mode<synchronous>, transform_indices = @transform_1, window_bounds = array<i64: 128, 128>}, {pipeline_mode = #tpu.pipeline_mode<synchronous>, transform_indices = @transform_2, window_bounds = array<i64: 1, 128>}, {pipeline_mode = #tpu.pipeline_mode<synchronous>, transform_indices = @transform_3, window_bounds = array<i64: 128, 128>}, {pipeline_mode = #tpu.pipeline_mode<synchronous>, transform_indices = @transform_4, window_bounds = array<i64: 1, 128>}, {transform_indices = @transform_5, window_bounds = array<i64: 1, 128>}]} {
    %c0 = arith.constant 0 : index
    %c0_0 = arith.constant 0 : index
    %0 = vector.load %arg1[%c0, %c0_0] : memref<128x128xbf16, #tpu.memory_space<vmem>>, vector<128x128xbf16>
    %c0_1 = arith.constant 0 : index
    %c0_2 = arith.constant 0 : index
    %1 = vector.load %arg2[%c0_1, %c0_2] : memref<128x128xbf16, #tpu.memory_space<vmem>>, vector<128x128xbf16>
    %cst = arith.constant dense<0.000000e+00> : vector<128x128xf32>
    %2 = tpu.matmul %0, %1, %cst {dimension_numbers = #tpu.dot_dimension_numbers<[1], [0], [0], [1], [0, 0, 1, 1], [], []>} : vector<128x128xbf16>, vector<128x128xbf16>, vector<128x128xf32> -> vector<128x128xf32>
    %c0_3 = arith.constant 0 : index
    %c0_4 = arith.constant 0 : index
    %3 = vector.load %arg3[%c0_3, %c0_4] : memref<1x128xf32, #tpu.memory_space<vmem>>, vector<1x128xf32>
    %4 = vector.broadcast %3 : vector<1x128xf32> to vector<128x128xf32>
    %5 = arith.addf %2, %4 : vector<128x128xf32>
    %cst_5 = arith.constant 0.000000e+00 : f32
    %6 = vector.broadcast %cst_5 : f32 to vector<128x128xf32>
    %7 = arith.maximumf %5, %6 : vector<128x128xf32>
    %8 = arith.truncf %7 : vector<128x128xf32> to vector<128x128xbf16>
    %c0_6 = arith.constant 0 : index
    %c0_7 = arith.constant 0 : index
    %9 = vector.load %arg4[%c0_6, %c0_7] : memref<128x128xbf16, #tpu.memory_space<vmem>>, vector<128x128xbf16>
    %cst_8 = arith.constant dense<0.000000e+00> : vector<128x128xf32>
    %10 = tpu.matmul %8, %9, %cst_8 {dimension_numbers = #tpu.dot_dimension_numbers<[1], [0], [0], [1], [0, 0, 1, 1], [], []>} : vector<128x128xbf16>, vector<128x128xbf16>, vector<128x128xf32> -> vector<128x128xf32>
    %c0_9 = arith.constant 0 : index
    %c0_10 = arith.constant 0 : index
    %11 = vector.load %arg5[%c0_9, %c0_10] : memref<1x128xf32, #tpu.memory_space<vmem>>, vector<1x128xf32>
    %12 = vector.broadcast %11 : vector<1x128xf32> to vector<128x128xf32>
    %13 = arith.addf %10, %12 : vector<128x128xf32>
    %14 = arith.mulf %13, %13 : vector<128x128xf32>
    %15 = tpu.transpose %14, [1, 0] : vector<128x128xf32> -> vector<128x128xf32>
    %cst_11 = arith.constant dense<0.000000e+00> : vector<128xf32>
    %16 = vector.multi_reduction <add>, %15, %cst_11 [0] : vector<128x128xf32> to vector<128xf32>
    %17 = vector.shape_cast %16 : vector<128xf32> to vector<1x128xf32>
    %18 = math.sqrt %17 : vector<1x128xf32>
    %c0_12 = arith.constant 0 : index
    %c0_13 = arith.constant 0 : index
    %19 = vector.load %arg6[%c0_12, %c0_13] : memref<1x128xf32, #tpu.memory_space<vmem>>, vector<1x128xf32>
    tpu.vector_store %arg6[%c0_12, %c0_13], %18 {strides = array<i32>} : memref<1x128xf32, #tpu.memory_space<vmem>>, vector<1x128xf32>,
    return
  }
  func.func @transform_0(%arg0: i32) -> (i32, i32) {
    %c0_i32 = arith.constant 0 : i32
    %c0_i32_0 = arith.constant 0 : i32
    return %arg0, %c0_i32 : i32, i32
  }
  func.func @transform_1(%arg0: i32) -> (i32, i32) {
    %c0_i32 = arith.constant 0 : i32
    %c0_i32_0 = arith.constant 0 : i32
    %c0_i32_1 = arith.constant 0 : i32
    return %c0_i32, %c0_i32_0 : i32, i32
  }
  func.func @transform_2(%arg0: i32) -> (i32, i32) {
    %c0_i32 = arith.constant 0 : i32
    %c0_i32_0 = arith.constant 0 : i32
    %c0_i32_1 = arith.constant 0 : i32
    return %c0_i32, %c0_i32_0 : i32, i32
  }
  func.func @transform_3(%arg0: i32) -> (i32, i32) {
    %c0_i32 = arith.constant 0 : i32
    %c0_i32_0 = arith.constant 0 : i32
    %c0_i32_1 = arith.constant 0 : i32
    return %c0_i32, %c0_i32_0 : i32, i32
  }
  func.func @transform_4(%arg0: i32) -> (i32, i32) {
    %c0_i32 = arith.constant 0 : i32
    %c0_i32_0 = arith.constant 0 : i32
    %c0_i32_1 = arith.constant 0 : i32
    return %c0_i32, %c0_i32_0 : i32, i32
  }
  func.func @transform_5(%arg0: i32) -> (i32, i32) {
    %c0_i32 = arith.constant 0 : i32
    %c0_i32_0 = arith.constant 0 : i32
    return %c0_i32, %arg0 : i32, i32
  }
}

</mosaic_0001>

<bundles_post_ra>
// kernel: tpu_custom_call.1
= control target key start
LH: loop header
LB: loop body
LE: loop exit
PB: predicated region body
PF: predicated region fallthrough
CT: control target
= control target key end

     0   :  { %10 = vsyncpa [#allocation3], 0  ;;  %s874_s0 = inlined_call_operand.hbm [shape: bf16[128,128], index: 0, kind: input, shape index: {}]   ;;  %s875_s1 = inlined_call_operand.hbm [shape: bf16[128,128], index: 1, kind: input, shape index: {}]   ;;  %s876_s2 = inlined_call_operand.vmem [shape: f32[1,128], index: 2, kind: input, shape index: {}]   ;;  %s877_s3 = inlined_call_operand.hbm [shape: bf16[128,128], index: 3, kind: input, shape index: {}]   ;;  %s878_s4 = inlined_call_operand.vmem [shape: f32[1,128], index: 4, kind: input, shape index: {}]   ;;  %s879_s5 = inlined_call_operand.hbm [shape: f32[1,128], index: 5, kind: output, shape index: {}]  }
   0x1   :  { %11 = vsyncpa [#allocation6], 0 }
   0x2   :  { %12 = vsyncpa [#allocation4], 0  ;;  %s820_s18 = smov [#allocation5]   ;;  %s821_s20 = smov [#allocation2]  }
   0x3   :  { %s30_s19 = sshll.u32 %s820_s18, 4  ;;  %s18_s21 = sshll.u32 %s821_s20, 4  ;;  %s31_s19 = int_to_ptr.vmem [resolvable:$true] %s30_s19  ;;  %s19_s21 = int_to_ptr.vmem [resolvable:$true] %s18_s21 }
   0x4   :  { %s742_s22 = scalar_lea.vmem %s31_s19, 1024  ;;  %p747_p1 = scmp.lt.s32.totalorder %s31_s19, %s31_s19 }
   0x5   :  { %p743_p0 = scmp.ne.s32.totalorder %s31_s19, %s742_s22  ;;  %p748_p2 = scmp.lt.s32.totalorder %s742_s22, %s742_s22 }
   0x7   :  { %p749_p3 = por %p748_p2, %p747_p1 }
   0x9   :  { %p750_p4 = pnand %p749_p3, %p743_p0 }
   0xb   :  { %753 = shalt.err (!%p750_p4)
}
   0xc   :  { %s822_s23 = smov 64   ;;  %s823_s24 = smov 4  }
   0xd   :  { %36 = dma.hbm_to_vmem [thread:$0]  %s875_s1, 1024, %s31_s19, [#allocation6], %s822_s23, %s822_s23, %s823_s24  }
   0xe   :  { %s762_s27 = scalar_lea.vmem %s19_s21, 1024  ;;  %p767_p6 = scmp.lt.s32.totalorder %s19_s21, %s19_s21 }
   0xf   :  { %p763_p5 = scmp.ne.s32.totalorder %s19_s21, %s762_s27  ;;  %p768_p7 = scmp.lt.s32.totalorder %s762_s27, %s762_s27 }
  0x11   :  { %p769_p8 = por %p768_p7, %p767_p6 }
  0x13   :  { %p770_p9 = pnand %p769_p8, %p763_p5 }
  0x15   :  { %773 = shalt.err (!%p770_p9)
}
  0x16   :  { %24 = dma.hbm_to_vmem [thread:$0]  %s874_s0, 1024, %s19_s21, [#allocation3], %s822_s23, %s822_s23, %s823_s24  }
  0x17   :  { %s824_s30 = smov [#allocation7]  }
  0x18   :  { %s44_s6 = sshll.u32 %s824_s30, 4  ;;  %s45_s6 = int_to_ptr.vmem [resolvable:$true] %s44_s6 }
  0x19   :  { %s782_s7 = scalar_lea.vmem %s45_s6, 1024  ;;  %p787_p11 = scmp.lt.s32.totalorder %s45_s6, %s45_s6 }
  0x1a   :  { %p783_p10 = scmp.ne.s32.totalorder %s45_s6, %s782_s7  ;;  %p788_p12 = scmp.lt.s32.totalorder %s782_s7, %s782_s7 }
  0x1c   :  { %p789_p13 = por %p788_p12, %p787_p11 }
  0x1e   :  { %p790_p0 = pnand %p789_p13, %p783_p10 }
  0x20   :  { %793 = shalt.err (!%p790_p0)
}
  0x21   :  { %50 = dma.hbm_to_vmem [thread:$0]  %s877_s3, 1024, %s45_s6, [#allocation6], %s822_s23, %s822_s23, %s823_s24  }
  0x22   :  { %814 = dma.done.wait [#allocation3], 1024  }
  0x23   :  { %815 = vsyncadd [#allocation3], 4294966272 }
  0x24   :  { %816 = dma.done.wait [#allocation6], 2048  }
  0x25   :  { %817 = vsyncadd [#allocation6], 4294965248  ;;  %v708_v0 = vld [vmem:[#allocation5 + $0x38] sm:$0xff]   ;;  %v709_v1 = vld [vmem:[#allocation5 + $0x30] sm:$0xff]  }
  0x26   :  { %638 = vmatprep.subr.bf16.mxu0 %v708_v0  ;;  %v710_v2 = vld [vmem:[#allocation5 + $0x28] sm:$0xff]   ;;  %v711_v3 = vld [vmem:[#allocation5 + $0x20] sm:$0xff]   ;;  %v712_v5 = vld [vmem:[#allocation5 + $0x18] sm:$0xff]  }
  0x27   :  { %639 = vmatpush3.bf16.msra.mxu0 %v708_v0  ;;  %v716_v4 = vld [vmem:[#allocation2] sm:$0xff]   ;;  %v713_v6 = vld [vmem:[#allocation5 + $0x10] sm:$0xff]   ;;  %v724_v7 = vld [vmem:[#allocation7 + $0x38] sm:$0xff]  }
  0x28   :  { %640 = vmatprep.subr.bf16.mxu0 %v709_v1  ;;  %654 = vmatprep.mubr.bf16.mxu0 %v716_v4  ;;  %v725_v8 = vld [vmem:[#allocation7 + $0x30] sm:$0xff]   ;;  %v714_v9 = vld [vmem:[#allocation5 + $0x8] sm:$0xff]   ;;  %v715_v11 = vld [vmem:[#allocation5] sm:$0xff]  }
  0x29   :  { %670 = vmatprep.subr.bf16.mxu1 %v724_v7  ;;  %v726_v10 = vld [vmem:[#allocation7 + $0x28] sm:$0xff]   ;;  %v727_v12 = vld [vmem:[#allocation7 + $0x20] sm:$0xff]   ;;  %v728_v13 = vld [vmem:[#allocation7 + $0x18] sm:$0xff]  }
  0x2a   :  { %671 = vmatpush3.bf16.msra.mxu1 %v724_v7  ;;  %v717_v14 = vld [vmem:[#allocation2 + $0x8] sm:$0xff]   ;;  %v718_v15 = vld [vmem:[#allocation2 + $0x10] sm:$0xff]   ;;  %v719_v16 = vld [vmem:[#allocation2 + $0x18] sm:$0xff]  }
  0x2b   :  { %641 = vmatpush3.bf16.msra.mxu0 %v709_v1  ;;  %672 = vmatprep.subr.bf16.mxu1 %v725_v8  ;;  %v720_v17 = vld [vmem:[#allocation2 + $0x20] sm:$0xff]   ;;  %v721_v18 = vld [vmem:[#allocation2 + $0x28] sm:$0xff]   ;;  %v722_v19 = vld [vmem:[#allocation2 + $0x30] sm:$0xff]  }
  0x2c   :  { %642 = vmatprep.subr.bf16.mxu0 %v710_v2  ;;  %v723_v20 = vld [vmem:[#allocation2 + $0x38] sm:$0xff]   ;;  %v729_v21 = vld [vmem:[#allocation7 + $0x10] sm:$0xff]   ;;  %v730_v22 = vld [vmem:[#allocation7 + $0x8] sm:$0xff]  }
  0x2d   :  { %v731_v23 = vld [vmem:[#allocation7] sm:$0xff]  }
  0x2e   :  { %673 = vmatpush3.bf16.msra.mxu1 %v725_v8  ;;  %v580_v26 = vld [vmem:[%s876_s2] ss:$0 sm:$0xff] }
  0x2f   :  { %643 = vmatpush3.bf16.msra.mxu0 %v710_v2  ;;  %674 = vmatprep.subr.bf16.mxu1 %v726_v10 }
  0x30   :  { %644 = vmatprep.subr.bf16.mxu0 %v711_v3 }
  0x32   :  { %675 = vmatpush3.bf16.msra.mxu1 %v726_v10 }
  0x33   :  { %645 = vmatpush3.bf16.msra.mxu0 %v711_v3  ;;  %676 = vmatprep.subr.bf16.mxu1 %v727_v12 }
  0x34   :  { %646 = vmatprep.subr.bf16.mxu0 %v712_v5 }
  0x36   :  { %677 = vmatpush3.bf16.msra.mxu1 %v727_v12 }
  0x37   :  { %647 = vmatpush3.bf16.msra.mxu0 %v712_v5  ;;  %678 = vmatprep.subr.bf16.mxu1 %v728_v13 }
  0x38   :  { %648 = vmatprep.subr.bf16.mxu0 %v713_v6 }
  0x3a   :  { %679 = vmatpush3.bf16.msra.mxu1 %v728_v13 }
  0x3b   :  { %649 = vmatpush3.bf16.msra.mxu0 %v713_v6  ;;  %680 = vmatprep.subr.bf16.mxu1 %v729_v21 }
  0x3c   :  { %650 = vmatprep.subr.bf16.mxu0 %v714_v9 }
  0x3e   :  { %681 = vmatpush3.bf16.msra.mxu1 %v729_v21 }
  0x3f   :  { %651 = vmatpush3.bf16.msra.mxu0 %v714_v9  ;;  %682 = vmatprep.subr.bf16.mxu1 %v730_v22 }
  0x40   :  { %652 = vmatprep.subr.bf16.mxu0 %v715_v11 }
  0x42   :  { %683 = vmatpush3.bf16.msra.mxu1 %v730_v22 }
  0x43   :  { %653 = vmatpush3.bf16.msra.mxu0 %v715_v11  ;;  %684 = vmatprep.subr.bf16.mxu1 %v731_v23 }
  0x46   :  { %655 = vmatmul.mubr.bf16.vlgmr.msra.gmra.mxu0 %v717_v14  ;;  %685 = vmatpush3.bf16.msra.mxu1 %v731_v23 }
  0x47   :  { %658 = vmatprep.mubr.bf16.mxu0 %v718_v15 }
  0x4e   :  { %659 = vmatmul.mubr.bf16.gmra.mxu0 %v719_v16 }
  0x4f   :  { %662 = vmatprep.mubr.bf16.mxu0 %v720_v17 }
  0x56   :  { %663 = vmatmul.mubr.bf16.gmra.mxu0 %v721_v18  ;;  %v597_v18 = vld [vmem:[%s878_s4] ss:$0 sm:$0xff]  ;;  %s825_s4 = smov [#allocation8]  }
  0x57   :  { %666 = vmatprep.mubr.bf16.mxu0 %v722_v19  ;;  %s570_s10 = sshll.u32 %s825_s4, 4  ;;  %s571_s10 = int_to_ptr.vmem [resolvable:$true] %s570_s10 }
  0x58   :  { %s794_s11 = scalar_lea.vmem %s571_s10, 16  ;;  %s798_s12 = scalar_lea.vmem %s571_s10, 32 }
  0x59   :  { %p795_p1 = scmp.ne.s32.totalorder %s571_s10, %s794_s11  ;;  %p799_p2 = scmp.lt.s32.totalorder %s571_s10, %s571_s10 }
  0x5a   :  { %p800_p3 = scmp.lt.s32.totalorder %s798_s12, %s794_s11 }
  0x5c   :  { %p801_p4 = por %p800_p3, %p799_p2 }
  0x5e   :  { %667 = vmatmul.mubr.bf16.gmra.mxu0 %v723_v20  ;;  %p802_p5 = pnand %p801_p4, %p795_p1 }
 0x106   :  { %v656_v24 = vpop.f32.mrf.mxu0 }
 0x107   :  { %v241_v30 = vadd.f32 %v656_v24, %v580_v26 }
 0x108   :  { %v232_v25 = vpop.f32.mrf.mxu0 }
 0x109   :  { %v233_v28 = vadd.f32 %v580_v26, %v232_v25  ;;  %v297_v37 = vmax.f32 %v241_v30, 0.0 }
 0x10a   :  { %v657_v27 = vpop.f32.mrf.mxu0 }
 0x10b   :  { %v244_v29 = vadd.f32 %v657_v27, %v580_v26  ;;  %v295_v35 = vmax.f32 %v233_v28, 0.0 }
 0x10c   :  { %v235_v31 = vpop.f32.mrf.mxu0 }
 0x10d   :  { %v236_v32 = vadd.f32 %v580_v26, %v235_v31  ;;  %v298_v33 = vmax.f32 %v244_v29, 0.0 }
 0x10e   :  { %v660_v34 = vpop.f32.mrf.mxu0 }
 0x10f   :  { %v296_v36 = vmax.f32 %v236_v32, 0.0  ;;  %v257_v38 = vadd.f32 %v660_v34, %v580_v26  ;;  %v312_v42 = vpack.c.bf16 %v298_v33, %v297_v37 }
 0x110   :  { %v248_v39 = vpop.f32.mrf.mxu0 }
 0x111   :  { %v249_v40 = vadd.f32 %v580_v26, %v248_v39  ;;  %v311_v41 = vpack.c.bf16 %v296_v36, %v295_v35  ;;  %v301_v45 = vmax.f32 %v257_v38, 0.0 }
 0x112   :  { %v661_v43 = vpop.f32.mrf.mxu0 }
 0x113   :  { %v260_v44 = vadd.f32 %v661_v43, %v580_v26  ;;  %686 = vmatprep.mubr.bf16.mxu1 %v311_v41  ;;  %v299_v47 = vmax.f32 %v249_v40, 0.0 }
 0x114   :  { %v251_v46 = vpop.f32.mrf.mxu0  ;;  %687 = vmatmul.mubr.bf16.vlgmr.msra.gmra.mxu1 %v312_v42 }
 0x115   :  { %v302_v48 = vmax.f32 %v260_v44, 0.0  ;;  %v252_v49 = vadd.f32 %v580_v26, %v251_v46 }
 0x116   :  { %v664_v50 = vpop.f32.mrf.mxu0 }
 0x117   :  { %v300_v51 = vmax.f32 %v252_v49, 0.0  ;;  %v314_v52 = vpack.c.bf16 %v302_v48, %v301_v45  ;;  %v273_v53 = vadd.f32 %v664_v50, %v580_v26 }
 0x118   :  { %v264_v54 = vpop.f32.mrf.mxu0 }
 0x119   :  { %v313_v55 = vpack.c.bf16 %v300_v51, %v299_v47  ;;  %v265_v56 = vadd.f32 %v580_v26, %v264_v54  ;;  %v305_v59 = vmax.f32 %v273_v53, 0.0 }
 0x11a   :  { %v665_v57 = vpop.f32.mrf.mxu0 }
 0x11b   :  { %690 = vmatprep.mubr.bf16.mxu1 %v313_v55  ;;  %v276_v58 = vadd.f32 %v665_v57, %v580_v26  ;;  %v303_v61 = vmax.f32 %v265_v56, 0.0 }
 0x11c   :  { %691 = vmatmul.mubr.bf16.gmra.mxu1 %v314_v52  ;;  %v267_v60 = vpop.f32.mrf.mxu0 }
 0x11d   :  { %v306_v62 = vmax.f32 %v276_v58, 0.0  ;;  %v268_v63 = vadd.f32 %v580_v26, %v267_v60 }
 0x11e   :  { %v668_v0 = vpop.f32.mrf.mxu0 }
 0x11f   :  { %v304_v1 = vmax.f32 %v268_v63, 0.0  ;;  %v316_v2 = vpack.c.bf16 %v306_v62, %v305_v59  ;;  %v289_v3 = vadd.f32 %v668_v0, %v580_v26 }
 0x120   :  { %v280_v4 = vpop.f32.mrf.mxu0 }
 0x121   :  { %v315_v5 = vpack.c.bf16 %v304_v1, %v303_v61  ;;  %v281_v6 = vadd.f32 %v580_v26, %v280_v4  ;;  %v309_v9 = vmax.f32 %v289_v3, 0.0 }
 0x122   :  { %v669_v7 = vpop.f32.mrf.mxu0 }
 0x123   :  { %694 = vmatprep.mubr.bf16.mxu1 %v315_v5  ;;  %v292_v8 = vadd.f32 %v669_v7, %v580_v26  ;;  %v307_v11 = vmax.f32 %v281_v6, 0.0 }
 0x124   :  { %695 = vmatmul.mubr.bf16.gmra.mxu1 %v316_v2  ;;  %v283_v10 = vpop.f32.mrf.mxu0 }
 0x125   :  { %v310_v12 = vmax.f32 %v292_v8, 0.0  ;;  %v284_v13 = vadd.f32 %v580_v26, %v283_v10 }
 0x127   :  { %v308_v14 = vmax.f32 %v284_v13, 0.0  ;;  %v318_v15 = vpack.c.bf16 %v310_v12, %v309_v9 }
 0x129   :  { %v317_v16 = vpack.c.bf16 %v308_v14, %v307_v11 }
 0x12b   :  { %698 = vmatprep.mubr.bf16.mxu1 %v317_v16 }
 0x12c   :  { %699 = vmatmul.mubr.bf16.gmra.mxu1 %v318_v15 }
 0x1d4   :  { %v688_v17 = vpop.f32.mrf.mxu1 }
 0x1d5   :  { %v433_v27 = vadd.f32 %v688_v17, %v597_v18 }
 0x1d6   :  { %v424_v19 = vpop.f32.mrf.mxu1 }
 0x1d7   :  { %v425_v20 = vadd.f32 %v597_v18, %v424_v19  ;;  %v489_v29 = vmul.f32 %v433_v27, %v433_v27 }
 0x1d8   :  { %v689_v21 = vpop.f32.mrf.mxu1 }
 0x1d9   :  { %v487_v22 = vmul.f32 %v425_v20, %v425_v20  ;;  %v436_v30 = vadd.f32 %v689_v21, %v597_v18 }
 0x1da   :  { %v427_v23 = vpop.f32.mrf.mxu1 }
 0x1db   :  { %v428_v24 = vadd.f32 %v597_v18, %v427_v23  ;;  %503 = vxpose.xlu0.b32.start [1/16] %v487_v22, 128  ;;  %v490_v32 = vmul.f32 %v436_v30, %v436_v30 }
 0x1dc   :  { %v692_v25 = vpop.f32.mrf.mxu1 }
 0x1dd   :  { %v488_v26 = vmul.f32 %v428_v24, %v428_v24  ;;  %v449_v38 = vadd.f32 %v692_v25, %v597_v18 }
 0x1de   :  { %v440_v28 = vpop.f32.mrf.mxu1 }
 0x1df   :  { %504 = vxpose.xlu0.b32.cont [2/16] %v488_v26, 128  ;;  %v441_v33 = vadd.f32 %v597_v18, %v440_v28  ;;  %v493_v41 = vmul.f32 %v449_v38, %v449_v38 }
 0x1e0   :  { %v693_v31 = vpop.f32.mrf.mxu1 }
 0x1e1   :  { %v491_v35 = vmul.f32 %v441_v33, %v441_v33  ;;  %v452_v42 = vadd.f32 %v693_v31, %v597_v18 }
 0x1e2   :  { %v443_v34 = vpop.f32.mrf.mxu1 }
 0x1e3   :  { %505 = vxpose.xlu0.b32.cont [3/16] %v489_v29, 128  ;;  %v444_v36 = vadd.f32 %v597_v18, %v443_v34  ;;  %v494_v44 = vmul.f32 %v452_v42, %v452_v42 }
 0x1e4   :  { %v696_v37 = vpop.f32.mrf.mxu1 }
 0x1e5   :  { %v492_v39 = vmul.f32 %v444_v36, %v444_v36  ;;  %v465_v50 = vadd.f32 %v696_v37, %v597_v18 }
 0x1e6   :  { %v456_v40 = vpop.f32.mrf.mxu1 }
 0x1e7   :  { %506 = vxpose.xlu0.b32.cont [4/16] %v490_v32, 128  ;;  %v457_v45 = vadd.f32 %v597_v18, %v456_v40  ;;  %v497_v53 = vmul.f32 %v465_v50, %v465_v50 }
 0x1e8   :  { %v697_v43 = vpop.f32.mrf.mxu1 }
 0x1e9   :  { %v495_v47 = vmul.f32 %v457_v45, %v457_v45  ;;  %v468_v54 = vadd.f32 %v697_v43, %v597_v18 }
 0x1ea   :  { %v459_v46 = vpop.f32.mrf.mxu1 }
 0x1eb   :  { %507 = vxpose.xlu0.b32.cont [5/16] %v491_v35, 128  ;;  %v460_v48 = vadd.f32 %v597_v18, %v459_v46  ;;  %v498_v56 = vmul.f32 %v468_v54, %v468_v54 }
 0x1ec   :  { %v700_v49 = vpop.f32.mrf.mxu1 }
 0x1ed   :  { %v496_v51 = vmul.f32 %v460_v48, %v460_v48  ;;  %v481_v61 = vadd.f32 %v700_v49, %v597_v18 }
 0x1ee   :  { %v472_v52 = vpop.f32.mrf.mxu1 }
 0x1ef   :  { %508 = vxpose.xlu0.b32.cont [6/16] %v492_v39, 128  ;;  %v473_v57 = vadd.f32 %v597_v18, %v472_v52  ;;  %v501_v63 = vmul.f32 %v481_v61, %v481_v61 }
 0x1f0   :  { %v701_v55 = vpop.f32.mrf.mxu1 }
 0x1f1   :  { %v499_v59 = vmul.f32 %v473_v57, %v473_v57  ;;  %v484_v0 = vadd.f32 %v701_v55, %v597_v18 }
 0x1f2   :  { %v475_v58 = vpop.f32.mrf.mxu1 }
 0x1f3   :  { %509 = vxpose.xlu0.b32.cont [7/16] %v493_v41, 128  ;;  %v476_v60 = vadd.f32 %v597_v18, %v475_v58  ;;  %v502_v1 = vmul.f32 %v484_v0, %v484_v0 }
 0x1f5   :  { %v500_v62 = vmul.f32 %v476_v60, %v476_v60 }
 0x1f7   :  { %510 = vxpose.xlu0.b32.cont [8/16] %v494_v44, 128 }
 0x1fb   :  { %511 = vxpose.xlu0.b32.cont [9/16] %v495_v47, 128 }
 0x1ff   :  { %512 = vxpose.xlu0.b32.cont [10/16] %v496_v51, 128 }
 0x203   :  { %513 = vxpose.xlu0.b32.cont [11/16] %v497_v53, 128 }
 0x207   :  { %514 = vxpose.xlu0.b32.cont [12/16] %v498_v56, 128 }
 0x20b   :  { %515 = vxpose.xlu0.b32.cont [13/16] %v499_v59, 128 }
 0x20f   :  { %516 = vxpose.xlu0.b32.cont [14/16] %v500_v62, 128 }
 0x213   :  { %517 = vxpose.xlu0.b32.cont [15/16] %v501_v63, 128 }
 0x217   :  { %518 = vxpose.xlu0.b32.end [16/16] %v502_v1, 128 }
 0x257   :  { %v519_v2 = vpop.trf.xlu0 }
 0x25b   :  { %v520_v3 = vpop.trf.xlu0 }
 0x25c   :  { %v535_v11 = vadd.f32 %v520_v3, %v519_v2 }
 0x25f   :  { %v521_v4 = vpop.trf.xlu0 }
 0x260   :  { %v536_v12 = vadd.f32 %v535_v11, %v521_v4 }
 0x263   :  { %v522_v5 = vpop.trf.xlu0 }
 0x264   :  { %v537_v14 = vadd.f32 %v536_v12, %v522_v5 }
 0x267   :  { %v523_v6 = vpop.trf.xlu0 }
 0x268   :  { %v538_v15 = vadd.f32 %v537_v14, %v523_v6 }
 0x26b   :  { %v524_v7 = vpop.trf.xlu0 }
 0x26c   :  { %v539_v17 = vadd.f32 %v538_v15, %v524_v7 }
 0x26f   :  { %v525_v8 = vpop.trf.xlu0 }
 0x270   :  { %v540_v18 = vadd.f32 %v539_v17, %v525_v8 }
 0x273   :  { %v526_v9 = vpop.trf.xlu0 }
 0x274   :  { %v541_v20 = vadd.f32 %v540_v18, %v526_v9 }
 0x277   :  { %v527_v10 = vpop.trf.xlu0 }
 0x278   :  { %v542_v21 = vadd.f32 %v541_v20, %v527_v10 }
 0x27b   :  { %v528_v13 = vpop.trf.xlu0 }
 0x27c   :  { %v543_v23 = vadd.f32 %v542_v21, %v528_v13 }
 0x27f   :  { %v529_v16 = vpop.trf.xlu0 }
 0x280   :  { %v544_v24 = vadd.f32 %v543_v23, %v529_v16 }
 0x283   :  { %v530_v19 = vpop.trf.xlu0 }
 0x284   :  { %v545_v27 = vadd.f32 %v544_v24, %v530_v19 }
 0x287   :  { %v531_v22 = vpop.trf.xlu0 }
 0x288   :  { %v546_v26 = vadd.f32 %v545_v27, %v531_v22 }
 0x28b   :  { %v532_v25 = vpop.trf.xlu0 }
 0x28c   :  { %v547_v29 = vadd.f32 %v546_v26, %v532_v25 }
 0x28f   :  { %v533_v28 = vpop.trf.xlu0 }
 0x290   :  { %v548_v30 = vadd.f32 %v547_v29, %v533_v28 }
 0x293   :  { %v534_v31 = vpop.trf.xlu0 }
 0x294   :  { %v549_v32 = vadd.f32 %v548_v30, %v534_v31 }
 0x296   :  { %v550_v33 = vrot.slane %v549_v32, 4 }
 0x298   :  { %v551_v34 = vadd.f32 %v550_v33, %v549_v32 }
 0x29a   :  { %v552_v35 = vrot.slane %v551_v34, 2 }
 0x29c   :  { %v553_v36 = vadd.f32 %v552_v35, %v551_v34 }
 0x29e   :  { %v554_v37 = vrot.slane %v553_v36, 1 }
 0x2a0   :  { %v555_v38 = vadd.f32 %v554_v37, %v553_v36 }
 0x2a2   :  { %732 = vrsqrt.f32 %v555_v38  ;;  %vm558_vm0 = vcmp.eq.f32.partialorder %v555_v38, inf  ;;  %v561_v41 = vand.u32 2147483648, %v555_v38  ;;  %vm560_vm1 = vcmp.eq.f32.partialorder %v555_v38, 0.0 }
 0x2af   :  { %v733_v39 = vpop.eup %732 }
 0x2b0   :  { %v557_v40 = vmul.f32 %v733_v39, %v555_v38 }
 0x2b2   :  { %v559_v42 = vsel %vm558_vm0, %v555_v38, %v557_v40 }
 0x2b3   :  { %v562_v43 = vsel %vm560_vm1, %v561_v41, %v559_v42 }
 0x2b4   :  { %563 = vst [vmem:[#allocation8] sm:$0x1] %v562_v43 }
 0x2b5   :  { %805 = shalt.err (!%p802_p5)
}
 0x2b6   :  { %573 = dma.vmem_to_hbm [thread:$0]  %s571_s10, 16, %s879_s5, [#allocation4]  }
 0x2b7   :  { %818 = dma.done.wait [#allocation4], 16  }
 0x2b8   :  { %819 = vsyncadd [#allocation4], 4294967280 }
 0x2b9   :  { %577 = vsyncpa [#allocation3], 1 }
 0x2ba   :  { %578 = vsyncpa [#allocation6], 1 }
 0x2bb   :  { %579 = vsyncpa [#allocation4], 1 }

</bundles_post_ra>
